<compile_context>
chip_gen: v6e
topology: v6e:2x2x1
jax: 0.10.0
libtpu: 0.0.40
codegen_flags: <defaults>
</compile_context>

<pallas_src>
import jax
import jax.numpy as jnp
from jax.experimental import pallas as pl
from jax.experimental.pallas import tpu as pltpu


def _row_tile(c):
    """Largest multiple-of-8 divisor of c (capped at 256), else c itself."""
    for cand in (256, 128, 64, 32, 16, 8):
        if cand < c and c % cand == 0:
            return cand
    return c


def _cam_kernel(gamma_ref, xq_ref, xkv_ref, o_ref):
    """One (batch, row-tile) step of the channel-attention module.

    gamma_ref : SMEM (1,)        f32   learnable residual scale
    xq_ref    : VMEM (1, TC, N)  f32   query rows (also the residual)
    xkv_ref   : VMEM (1, C, N)   bf16  full key/value slab for this batch
    o_ref     : VMEM (1, TC, N)  f32   output rows
    """
    g = gamma_ref[0]
    q = xq_ref[0]                                    # (TC, N) f32
    kv = xkv_ref[0]                                  # (C, N)  bf16
    q_bf = q.astype(jnp.bfloat16)

    # energy[i, j] = <x_i, x_j>  -- contract the spatial (lane) axis. bf16 MXU,
    # f32 accumulate.
    energy = jax.lax.dot_general(
        q_bf, kv, (((1,), (1,)), ((), ())),
        preferred_element_type=jnp.float32)           # (TC, C) f32

    # PyTorch: softmax(rowmax(energy) - energy, dim=-1), numerically stable.
    m = jnp.max(energy, axis=-1, keepdims=True)
    en = m - energy                                   # >= 0
    en = en - jnp.max(en, axis=-1, keepdims=True)     # softmax max-shift
    p = jnp.exp(en)
    denom = jnp.sum(p, axis=-1, keepdims=True)
    att = p * pl.reciprocal(denom, approx=False)      # (TC, C) f32

    # out = attention @ x_flat   (bf16 MXU, f32 accumulate)
    out = jnp.dot(att.astype(jnp.bfloat16), kv,
                  preferred_element_type=jnp.float32)  # (TC, N) f32

    # Residual in f32 (no double rounding through bf16).
    o_ref[0] = (g * out + q).astype(o_ref.dtype)


@jax.jit
def cam_forward(x, gamma):
    """x: (B, C, H, W) float32, gamma: (1,) float32 -> (B, C, H, W) float32."""
    b, c, h, w = x.shape
    n = h * w
    x_flat = x.reshape(b, c, n).astype(jnp.float32)
    x_bf = x_flat.astype(jnp.bfloat16)       # single-pass bf16 MXU operand
    tc = _row_tile(c)
    grid = (b, c // tc)

    # Rough VMEM budget: double-buffered kv / q / out blocks + softmax temps.
    blk_bytes = (2 * c * n * 2            # kv bf16 slab (double-buffered)
                 + 2 * tc * n * 4         # q f32 tile
                 + 2 * tc * n * 4         # out f32 tile
                 + 4 * tc * c * 4)        # energy / attention temporaries
    vmem_limit = int(min(max(blk_bytes + (8 << 20), 32 << 20), 64 << 20))

    cost = pl.CostEstimate(
        flops=4 * b * c * c * n,                  # two bmm's
        transcendentals=b * c * c,                # softmax exp
        bytes_accessed=b * c * n * (4 + 2 + 4))   # f32 in + bf16 in + f32 out

    out = pl.pallas_call(
        _cam_kernel,
        out_shape=jax.ShapeDtypeStruct((b, c, n), jnp.float32),
        grid_spec=pltpu.PrefetchScalarGridSpec(
            num_scalar_prefetch=0,
            grid=grid,
            in_specs=[
                pl.BlockSpec(memory_space=pltpu.MemorySpace.SMEM),      # gamma
                pl.BlockSpec((1, tc, n), lambda bi, ci: (bi, ci, 0)),   # q/res
                pl.BlockSpec((1, c, n), lambda bi, ci: (bi, 0, 0)),     # kv
            ],
            out_specs=pl.BlockSpec((1, tc, n), lambda bi, ci: (bi, ci, 0)),
        ),
        compiler_params=pltpu.CompilerParams(
            dimension_semantics=("parallel", "parallel"),
            vmem_limit_bytes=vmem_limit),
        cost_estimate=cost,
    )(gamma, x_flat, x_bf)
    return out.reshape(b, c, h, w)


def init_cam_params():
    """Module's fresh init: gamma = zeros(1) (output reduces to identity)."""
    return jnp.zeros((1,), jnp.float32)


def cam_reference(x, gamma):
    """Pure-JAX reference with matching bf16 matmul operands."""
    b, c, h, w = x.shape
    xf = x.reshape(b, c, h * w).astype(jnp.float32)
    xb = xf.astype(jnp.bfloat16)
    energy = jnp.einsum("bcn,bdn->bcd", xb, xb,
                        preferred_element_type=jnp.float32)
    en = jnp.max(energy, axis=-1, keepdims=True) - energy
    att = jax.nn.softmax(en, axis=-1)
    out = jnp.einsum("bcd,bdn->bcn", att.astype(jnp.bfloat16), xb,
                     preferred_element_type=jnp.float32)
    return gamma.reshape(1, 1, 1, 1) * out.reshape(b, c, h, w) + x


if __name__ == "__main__":
    key = jax.random.PRNGKey(0)
    kx, _ = jax.random.split(key)

    # Small shapes consistent with the module: B x C x H x W feature map.
    x = jax.random.normal(kx, (2, 64, 16, 16), jnp.float32)

    # The module initializes gamma to 0 (output == x); use a nonzero "learned"
    # value so the attention path is actually exercised and verified.
    gamma = jnp.array([0.5], jnp.float32)

    y = cam_forward(x, gamma)
    y = jax.block_until_ready(y)

    assert y.shape == x.shape, y.shape
    assert bool(jnp.all(jnp.isfinite(y)))

    y_ref = cam_reference(x, gamma)
    err = float(jnp.max(jnp.abs(y - y_ref)))
    assert jnp.allclose(y, y_ref, atol=2e-2, rtol=2e-2), err

    # Fresh-init gamma=0 must reduce to identity (faithful to the module).
    y0 = jax.block_until_ready(cam_forward(x, init_cam_params()))
    assert jnp.allclose(y0, x, atol=1e-5)

    print("KERNEL_OK")
</pallas_src>

<mosaic_0001>
module attributes {stable_mosaic.version = 11 : i64} {
  func.func @_cam_kernel(%arg0: i32, %arg1: i32, %arg2: memref<1xf32, #tpu.memory_space<smem>>, %arg3: memref<1x32x256xf32, #tpu.memory_space<vmem>>, %arg4: memref<1x64x256xbf16, #tpu.memory_space<vmem>>, %arg5: memref<1x32x256xf32, #tpu.memory_space<vmem>>) attributes {dimension_semantics = [#tpu.dimension_semantics<parallel>, #tpu.dimension_semantics<parallel>], iteration_bounds = array<i64: 2, 2>, scalar_prefetch = 0 : i64, scratch_operands = 0 : i64, tpu.core_type = #tpu.core_type<tc>, window_params = [{transform_indices = @transform_0, window_bounds = array<i64: 1>}, {transform_indices = @transform_1, window_bounds = array<i64: 1, 32, 256>}, {transform_indices = @transform_2, window_bounds = array<i64: 1, 64, 256>}, {transform_indices = @transform_3, window_bounds = array<i64: 1, 32, 256>}]} {
    %c0 = arith.constant 0 : index
    %0 = memref.load %arg2[%c0] : memref<1xf32, #tpu.memory_space<smem>>
    %c0_0 = arith.constant 0 : index
    %c0_1 = arith.constant 0 : index
    %c0_2 = arith.constant 0 : index
    %1 = vector.load %arg3[%c0_0, %c0_1, %c0_2] : memref<1x32x256xf32, #tpu.memory_space<vmem>>, vector<1x32x256xf32>
    %2 = vector.shape_cast %1 : vector<1x32x256xf32> to vector<32x256xf32>
    %c0_3 = arith.constant 0 : index
    %c0_4 = arith.constant 0 : index
    %c0_5 = arith.constant 0 : index
    %3 = vector.load %arg4[%c0_3, %c0_4, %c0_5] : memref<1x64x256xbf16, #tpu.memory_space<vmem>>, vector<1x64x256xbf16>
    %4 = vector.shape_cast %3 : vector<1x64x256xbf16> to vector<64x256xbf16>
    %5 = arith.truncf %2 : vector<32x256xf32> to vector<32x256xbf16>
    %cst = arith.constant dense<0.000000e+00> : vector<32x64xf32>
    %6 = tpu.matmul %5, %4, %cst {dimension_numbers = #tpu.dot_dimension_numbers<[1], [1], [0], [0], [0, 0, 1, 0], [], []>} : vector<32x256xbf16>, vector<64x256xbf16>, vector<32x64xf32> -> vector<32x64xf32>
    %cst_6 = arith.constant dense<0xFF800000> : vector<32xf32>
    %7 = vector.multi_reduction <maximumf>, %6, %cst_6 [1] : vector<32x64xf32> to vector<32xf32>
    %8 = vector.shape_cast %7 : vector<32xf32> to vector<32x1xf32>
    %9 = vector.broadcast %8 : vector<32x1xf32> to vector<32x64xf32>
    %10 = arith.subf %9, %6 : vector<32x64xf32>
    %cst_7 = arith.constant dense<0xFF800000> : vector<32xf32>
    %11 = vector.multi_reduction <maximumf>, %10, %cst_7 [1] : vector<32x64xf32> to vector<32xf32>
    %12 = vector.shape_cast %11 : vector<32xf32> to vector<32x1xf32>
    %13 = vector.broadcast %12 : vector<32x1xf32> to vector<32x64xf32>
    %14 = arith.subf %10, %13 : vector<32x64xf32>
    %15 = math.exp %14 : vector<32x64xf32>
    %cst_8 = arith.constant dense<0.000000e+00> : vector<32xf32>
    %16 = vector.multi_reduction <add>, %15, %cst_8 [1] : vector<32x64xf32> to vector<32xf32>
    %17 = vector.shape_cast %16 : vector<32xf32> to vector<32x1xf32>
    %18 = tpu.reciprocal %17 : vector<32x1xf32> -> vector<32x1xf32>
    %19 = vector.broadcast %18 : vector<32x1xf32> to vector<32x64xf32>
    %20 = arith.mulf %15, %19 : vector<32x64xf32>
    %21 = arith.truncf %20 : vector<32x64xf32> to vector<32x64xbf16>
    %cst_9 = arith.constant dense<0.000000e+00> : vector<32x256xf32>
    %22 = tpu.matmul %21, %4, %cst_9 {dimension_numbers = #tpu.dot_dimension_numbers<[1], [0], [0], [1], [0, 0, 1, 1], [], []>} : vector<32x64xbf16>, vector<64x256xbf16>, vector<32x256xf32> -> vector<32x256xf32>
    %23 = vector.broadcast %0 : f32 to vector<32x256xf32>
    %24 = arith.mulf %23, %22 : vector<32x256xf32>
    %25 = arith.addf %24, %2 : vector<32x256xf32>
    %c0_10 = arith.constant 0 : index
    %c0_11 = arith.constant 0 : index
    %c0_12 = arith.constant 0 : index
    %26 = vector.load %arg5[%c0_10, %c0_11, %c0_12] : memref<1x32x256xf32, #tpu.memory_space<vmem>>, vector<1x32x256xf32>
    %27 = vector.shape_cast %26 : vector<1x32x256xf32> to vector<32x256xf32>
    %28 = vector.shape_cast %25 : vector<32x256xf32> to vector<1x32x256xf32>
    tpu.vector_store %arg5[%c0_10, %c0_11, %c0_12], %28 {strides = array<i32>} : memref<1x32x256xf32, #tpu.memory_space<vmem>>, vector<1x32x256xf32>,
    return
  }
  func.func @transform_0(%arg0: i32, %arg1: i32) -> i32 {
    %c0_i32 = arith.constant 0 : i32
    %c0_i32_0 = arith.constant 0 : i32
    return %c0_i32 : i32
  }
  func.func @transform_1(%arg0: i32, %arg1: i32) -> (i32, i32, i32) {
    %c0_i32 = arith.constant 0 : i32
    %c0_i32_0 = arith.constant 0 : i32
    return %arg0, %arg1, %c0_i32 : i32, i32, i32
  }
  func.func @transform_2(%arg0: i32, %arg1: i32) -> (i32, i32, i32) {
    %c0_i32 = arith.constant 0 : i32
    %c0_i32_0 = arith.constant 0 : i32
    %c0_i32_1 = arith.constant 0 : i32
    return %arg0, %c0_i32, %c0_i32_0 : i32, i32, i32
  }
  func.func @transform_3(%arg0: i32, %arg1: i32) -> (i32, i32, i32) {
    %c0_i32 = arith.constant 0 : i32
    %c0_i32_0 = arith.constant 0 : i32
    return %arg0, %arg1, %c0_i32 : i32, i32, i32
  }
}

</mosaic_0001>

<bundles_post_ra>
// kernel: cam_forward.1
= control target key start
LH: loop header
LB: loop body
LE: loop exit
PB: predicated region body
PF: predicated region fallthrough
CT: control target
= control target key end

     0   :  { %s766_s14 = smov 0   ;;  %s768_s15 = smov 0   ;;  %s883_s0 = inlined_call_operand.<no memory space> [shape: f32[1], index: 0, kind: input, shape index: {}]   ;;  %s884_s1 = inlined_call_operand.vmem [shape: f32[2,64,256], index: 1, kind: input, shape index: {}]   ;;  %s885_s2 = inlined_call_operand.vmem [shape: bf16[2,64,256], index: 2, kind: input, shape index: {}]   ;;  %s886_s3 = inlined_call_operand.vmem [shape: f32[2,64,256], index: 3, kind: output, shape index: {}]  }
   0x1   :  { %8 = sst [smem:[#allocation2]] %s883_s0  ;;  %s770_s16 = smov 0  }
   0x2   :  { %s772_s17 = smov 0   ;;  %s774_s18 = smov 0  }
   0x3 LB: > { %s23_s0 = sadd.s32 1, %s732_s16  ;;  %s26_s19 = sadd.s32 1, %s736_s17  ;;  %s740_s18 = sphi %s774_s18, %s14_s18   ;;  %s736_s17 = sphi %s772_s17, %s890_s17   ;;  %s732_s16 = sphi %s770_s16, %s889_s16   ;;  %s728_s15 = sphi %s768_s15, %s888_s15   ;;  %s724_s14 = sphi %s766_s14, %s887_s14  }
   0x4   : > { %p24_p0 = scmp.ge.s32.totalorder %s23_s0, 2  ;;  %p609_p1 = scmp.ge.s32.totalorder %s740_s18, 1 }
   0x5   : > { %p170_p2 = scmp.lt.s32.totalorder %s740_s18, 5 }
   0x6   : > { %s892_s0 = smov (%p24_p0, %s23_s0), 0  ;;  %s894_s19 = smov (!%p24_p0, %s26_s19), %s736_s17 }
   0x7   : > { %p171_p3 = pnand %p609_p1, %p170_p2  ;;  %p28_p4 = scmp.ge.s32.totalorder %s894_s19, 2 }
   0x8   : > { %p210_p5 = scmp.lt.s32.totalorder (!%p171_p3), %s728_s15, 1  ;;  %s610_s20 = sshll.u32 (!%p171_p3), %s724_s14, 2 }
   0x9   : > { %s896_s19 = smov (%p28_p4, %s894_s19), 0  ;;  %174 = sbr.rel (%p171_p3) target bundleno = 914 (0x392), region = 32 }
   0xa   : > { %p212_p6 = scmp.lt.s32.totalorder (!%p171_p3), %s610_s20, 7  ;;  %s237_s5 = sld [smem:[#allocation2]] (!%p171_p3) }
   0xe   : > { %s898_s15 = smov (!%p210_p5, %s728_s15), 1  ;;  %s900_s20 = smov (!%p212_p6, %s610_s20), 7  ;;  %vm347_vm0 = vcmask 523264  }
   0xf   : > { %s632_s21 = sshll.u32 %s898_s15, 6  ;;  %s612_s22 = sshll.u32 %s898_s15, 4 }
  0x10   : > { %s224_s25 = scalar_lea.vmem %s885_s2, %s632_s21  ;;  %s611_s26 = sshll.u32 %s900_s20, 1 }
  0x11   : > { %v674_v0 = vld [vmem:[%s224_s25 + $0x34] ss:$8 sps:$4 sm:$0xff]   ;;  %s799_s27 = sadd.s32 %s612_s22, %s611_s26  ;;  %v676_v1 = vld [vmem:[%s224_s25 + $0x30] ss:$8 sps:$4 sm:$0xff]   ;;  %v677_v2 = vld [vmem:[%s224_s25 + $0x24] ss:$8 sps:$4 sm:$0xff]  }
  0x12   : > { %s613_s28 = sshll.u32 %s799_s27, 3  ;;  %306 = vmatprep.subr.bf16.mxu0 %v674_v0  ;;  %424 = vmatprep.subr.bf16.mxu1 %v674_v0  ;;  %v679_v3 = vld [vmem:[%s224_s25 + $0x20] ss:$8 sps:$4 sm:$0xff]   ;;  %v680_v6 = vld [vmem:[%s224_s25 + $0x14] ss:$8 sps:$4 sm:$0xff]   ;;  %v742_v0 = vmov 0  }
  0x13   : > { %s807_s4 = scalar_lea.vmem %s884_s1, %s613_s28  ;;  %307 = vmatpush1.bf16.xpose.msra.mxu0 %v676_v1  ;;  %425 = vmatpush1.bf16.msra.mxu1 %v676_v1  ;;  %v682_v8 = vld [vmem:[%s224_s25 + $0x10] ss:$8 sps:$4 sm:$0xff]   ;;  %v683_v9 = vld [vmem:[%s224_s25 + $0x4] ss:$8 sps:$4 sm:$0xff]   ;;  %v685_v10 = vld [vmem:[%s224_s25] ss:$8 sps:$4 sm:$0xff]   ;;  %s234_s8 = scalar_lea.vmem %s886_s3, %s613_s28 }
  0x14   : > { %308 = vmatprep.subr.bf16.mxu0 %v677_v2  ;;  %426 = vmatprep.subr.bf16.mxu1 %v677_v2  ;;  %v810_v4 = vld [vmem:[%s807_s4 + $0x8] sm:$0xff]  ;;  %v813_v5 = vld [vmem:[%s807_s4 + $0x18] sm:$0xff]  ;;  %v818_v11 = vld [vmem:[%s807_s4] sm:$0xff] }
  0x15   : > { %v255_v7 = vpack.c.bf16 %v813_v5, %v810_v4  ;;  %v821_v12 = vld [vmem:[%s807_s4 + $0x10] sm:$0xff]  ;;  %v824_v13 = vld [vmem:[%s807_s4 + $0x28] sm:$0xff]  ;;  %v827_v14 = vld [vmem:[%s807_s4 + $0x38] sm:$0xff]  ;;  %448 = vmatprep.mubr.bf16.mxu1 %v742_v0 }
  0x16   : > { %v254_v15 = vpack.c.bf16 %v821_v12, %v818_v11  ;;  %v257_v16 = vpack.c.bf16 %v827_v14, %v824_v13  ;;  %v834_v17 = vld [vmem:[%s807_s4 + $0x20] sm:$0xff]  ;;  %v837_v18 = vld [vmem:[%s807_s4 + $0x30] sm:$0xff] }
  0x17   : > { %427 = vmatpush1.bf16.msra.mxu1 %v679_v3  ;;  %330 = vmatprep.mubr.bf16.mxu0 %v255_v7  ;;  %v256_v19 = vpack.c.bf16 %v837_v18, %v834_v17 }
  0x18   : > { %428 = vmatprep.subr.bf16.mxu1 %v680_v6 }
  0x1b   : > { %309 = vmatpush1.bf16.xpose.msra.mxu0 %v679_v3  ;;  %429 = vmatpush1.bf16.msra.mxu1 %v682_v8 }
  0x1c   : > { %310 = vmatprep.subr.bf16.mxu0 %v680_v6  ;;  %430 = vmatprep.subr.bf16.mxu1 %v683_v9 }
  0x1f   : > { %431 = vmatpush1.bf16.msra.mxu1 %v685_v10 }
  0x23   : > { %311 = vmatpush1.bf16.xpose.msra.mxu0 %v682_v8 }
  0x24   : > { %312 = vmatprep.subr.bf16.mxu0 %v683_v9 }
  0x2b   : > { %313 = vmatpush1.bf16.xpose.msra.mxu0 %v685_v10 }
  0x32   : > { %331 = vmatmul.mubr.bf16.vlgmr.msra.gmra.mxu0 %v254_v15 }
  0x33   : > { %338 = vmatprep.mubr.bf16.mxu0 %v257_v16 }
  0x3a   : > { %339 = vmatmul.mubr.bf16.gmra.mxu0 %v256_v19 }
  0xf2   : > { %v332_v20 = vpop.f32.mrf.mxu0 }
  0xf3   : > { %v348_v21 = vsel %vm347_vm0, %v332_v20, -inf }
  0xf4   : > { %349 = vmax.xlane.f32.xlu0 %v348_v21  ;;  %v334_v22 = vpop.f32.mrf.mxu0 }
  0xf6   : > { %v335_v23 = vpop.f32.mrf.mxu0 }
  0xf7   : > { %v351_v24 = vsel %vm347_vm0, %v335_v23, -inf }
  0xf8   : > { %352 = vmax.xlane.f32.xlu0 %v351_v24  ;;  %v337_v25 = vpop.f32.mrf.mxu0 }
  0xfa   : > { %v340_v26 = vpop.f32.mrf.mxu0 }
  0xfb   : > { %v354_v27 = vsel %vm347_vm0, %v340_v26, -inf }
  0xfc   : > { %355 = vmax.xlane.f32.xlu1 %v354_v27  ;;  %v342_v28 = vpop.f32.mrf.mxu0 }
  0xfe   : > { %v343_v29 = vpop.f32.mrf.mxu0 }
  0xff   : > { %v357_v30 = vsel %vm347_vm0, %v343_v29, -inf }
 0x100   : > { %358 = vmax.xlane.f32.xlu1 %v357_v30  ;;  %v345_v31 = vpop.f32.mrf.mxu0 }
 0x17d   : > { %v350_v32 = vpop.xlane.xlu0 %349 }
 0x17e   : > { %v360_v33 = vsub.f32 %v350_v32, %v332_v20 }
 0x180   : > { %v364_v34 = vsel %vm347_vm0, %v360_v33, -inf }
 0x181   : > { %365 = vmax.xlane.f32.xlu0 %v364_v34  ;;  %v353_v35 = vpop.xlane.xlu0 %352 }
 0x182   : > { %v361_v36 = vsub.f32 %v353_v35, %v335_v23  ;;  %v469_v23 = vstv %s237_s5 }
 0x184   : > { %v367_v37 = vsel %vm347_vm0, %v361_v36, -inf }
 0x185   : > { %v356_v38 = vpop.xlane.xlu1 %355  ;;  %368 = vmax.xlane.f32.xlu1 %v367_v37 }
 0x186   : > { %v362_v39 = vsub.f32 %v356_v38, %v340_v26 }
 0x188   : > { %v370_v40 = vsel %vm347_vm0, %v362_v39, -inf }
 0x189   : > { %371 = vmax.xlane.f32.xlu0 %v370_v40  ;;  %v359_v41 = vpop.xlane.xlu1 %358 }
 0x18a   : > { %v363_v42 = vsub.f32 %v359_v41, %v343_v29 }
 0x18c   : > { %v373_v43 = vsel %vm347_vm0, %v363_v42, -inf }
 0x18d   : > { %374 = vmax.xlane.f32.xlu1 %v373_v43 }
 0x20a   : > { %v366_v44 = vpop.xlane.xlu0 %365 }
 0x20b   : > { %v376_v45 = vsub.f32 %v360_v33, %v366_v44 }
 0x20d   : > { %v380_v46 = vmul.f32 1.442695, %v376_v45 }
 0x20e   : > { %v369_v47 = vpop.xlane.xlu1 %368 }
 0x20f   : > { %686 = vpow2.f32 %v380_v46  ;;  %v377_v48 = vsub.f32 %v361_v36, %v369_v47 }
 0x211   : > { %v382_v49 = vmul.f32 1.442695, %v377_v48 }
 0x212   : > { %v372_v50 = vpop.xlane.xlu0 %371 }
 0x213   : > { %688 = vpow2.f32 %v382_v49  ;;  %v378_v51 = vsub.f32 %v362_v39, %v372_v50 }
 0x215   : > { %v384_v52 = vmul.f32 1.442695, %v378_v51 }
 0x216   : > { %v375_v53 = vpop.xlane.xlu1 %374 }
 0x217   : > { %690 = vpow2.f32 %v384_v52  ;;  %v379_v54 = vsub.f32 %v363_v42, %v375_v53 }
 0x219   : > { %v386_v55 = vmul.f32 1.442695, %v379_v54 }
 0x21b   : > { %692 = vpow2.f32 %v386_v55 }
 0x21c   : > { %v687_v56 = vpop.eup %686 }
 0x21d   : > { %v388_v57 = vsel %vm347_vm0, %v687_v56, 0.0 }
 0x21e   : > { %389 = vadd.xlane.f32.xlu0 %v388_v57 }
 0x220   : > { %v689_v58 = vpop.eup %688 }
 0x221   : > { %v391_v59 = vsel %vm347_vm0, %v689_v58, 0.0 }
 0x222   : > { %392 = vadd.xlane.f32.xlu1 %v391_v59 }
 0x224   : > { %v691_v60 = vpop.eup %690 }
 0x225   : > { %v394_v61 = vsel %vm347_vm0, %v691_v60, 0.0 }
 0x226   : > { %395 = vadd.xlane.f32.xlu0 %v394_v61 }
 0x228   : > { %v693_v62 = vpop.eup %692 }
 0x229   : > { %v397_v63 = vsel %vm347_vm0, %v693_v62, 0.0 }
 0x22a   : > { %398 = vadd.xlane.f32.xlu1 %v397_v63 }
 0x2a7   : > { %v390_v1 = vpop.xlane.xlu0 %389 }
 0x2a8   : > { %694 = vrcp.f32 %v390_v1 }
 0x2ab   : > { %v393_v2 = vpop.xlane.xlu1 %392 }
 0x2ac   : > { %696 = vrcp.f32 %v393_v2 }
 0x2af   : > { %v396_v3 = vpop.xlane.xlu0 %395 }
 0x2b0   : > { %698 = vrcp.f32 %v396_v3 }
 0x2b3   : > { %v399_v6 = vpop.xlane.xlu1 %398 }
 0x2b4   : > { %700 = vrcp.f32 %v399_v6 }
 0x2b5   : > { %v695_v7 = vpop.eup %694 }
 0x2b6   : > { %v404_v9 = vmul.f32 %v695_v7, %v687_v56 }
 0x2b9   : > { %v697_v8 = vpop.eup %696 }
 0x2ba   : > { %v405_v10 = vmul.f32 %v697_v8, %v689_v58 }
 0x2bc   : > { %v408_v15 = vpack.c.bf16 %v405_v10, %v404_v9 }
 0x2bd   : > { %v699_v16 = vpop.eup %698 }
 0x2be   : > { %628 = vmatmul.mubr.msk.bf16.vlgmr.msra.gmra.mxu1 %vm347_vm0, %v408_v15  ;;  %v406_v20 = vmul.f32 %v699_v16, %v691_v60 }
 0x2bf   : > { %458 = vmatprep.mubr.bf16.mxu1 %v742_v0 }
 0x2c1   : > { %v701_v19 = vpop.eup %700 }
 0x2c2   : > { %v407_v21 = vmul.f32 %v701_v19, %v693_v62 }
 0x2c4   : > { %v409_v22 = vpack.c.bf16 %v407_v21, %v406_v20 }
 0x2c6   : > { %629 = vmatmul.mubr.msk.bf16.gmra.mxu1 %vm347_vm0, %v409_v22 }
 0x37e   : > { %v450_v24 = vpop.f32.mrf.mxu1 }
 0x37f   : > { %v470_v25 = vmul.f32 %v469_v23, %v450_v24 }
 0x380   : > { %v452_v26 = vpop.f32.mrf.mxu1 }
 0x381   : > { %v478_v27 = vadd.f32 %v470_v25, %v818_v11  ;;  %v471_v28 = vmul.f32 %v469_v23, %v452_v26 }
 0x382   : > { %v454_v29 = vpop.f32.mrf.mxu1 }
 0x383   : > { %486 = vst [vmem:[%s234_s8] sm:$0xff] %v478_v27  ;;  %v479_v30 = vadd.f32 %v471_v28, %v810_v4  ;;  %v472_v31 = vmul.f32 %v469_v23, %v454_v29 }
 0x384   : > { %v456_v32 = vpop.f32.mrf.mxu1 }
 0x385   : > { %487 = vst [vmem:[%s234_s8 + $0x8] sm:$0xff] %v479_v30  ;;  %v480_v33 = vadd.f32 %v472_v31, %v821_v12  ;;  %v473_v34 = vmul.f32 %v469_v23, %v456_v32 }
 0x386   : > { %v460_v35 = vpop.f32.mrf.mxu1 }
 0x387   : > { %488 = vst [vmem:[%s234_s8 + $0x10] sm:$0xff] %v480_v33  ;;  %v481_v36 = vadd.f32 %v473_v34, %v813_v5  ;;  %v474_v37 = vmul.f32 %v469_v23, %v460_v35 }
 0x388   : > { %v462_v38 = vpop.f32.mrf.mxu1 }
 0x389   : > { %489 = vst [vmem:[%s234_s8 + $0x18] sm:$0xff] %v481_v36  ;;  %v482_v11 = vadd.f32 %v474_v37, %v834_v17  ;;  %v475_v39 = vmul.f32 %v469_v23, %v462_v38 }
 0x38a   : > { %v464_v40 = vpop.f32.mrf.mxu1 }
 0x38b   : > { %490 = vst [vmem:[%s234_s8 + $0x20] sm:$0xff] %v482_v11  ;;  %v483_v4 = vadd.f32 %v475_v39, %v824_v13  ;;  %v476_v41 = vmul.f32 %v469_v23, %v464_v40 }
 0x38c   : > { %v466_v42 = vpop.f32.mrf.mxu1 }
 0x38d   : > { %491 = vst [vmem:[%s234_s8 + $0x28] sm:$0xff] %v483_v4  ;;  %v484_v12 = vadd.f32 %v476_v41, %v837_v18  ;;  %v477_v43 = vmul.f32 %v469_v23, %v466_v42 }
 0x38f   : > { %492 = vst [vmem:[%s234_s8 + $0x30] sm:$0xff] %v484_v12  ;;  %v485_v44 = vadd.f32 %v477_v43, %v827_v14 }
 0x391   : > { %493 = vst [vmem:[%s234_s8 + $0x38] sm:$0xff] %v485_v44 }
 0x392 PF: > { %s14_s18 = sadd.s32 1, %s740_s18   ;;  %s887_s14 = smov %s732_s16 }
 0x393   : > { %p11_p7 = scmp.ge.s32.totalorder %s14_s18, 6   ;;  %s888_s15 = smov %s736_s17 }
 0x394   : > { %s889_s16 = smov %s892_s0  ;;  %s890_s17 = smov %s896_s19 }
 0x395   :  { %13 = sbr.rel (!%p11_p7) target bundleno = 3 (0x3), region = 65 }

</bundles_post_ra>
